<compile_context>
chip_gen: v5e
topology: v5e:2x2
jax: 0.10.0
libtpu: 0.0.40
codegen_flags: <defaults>
</compile_context>

<pallas_src>
import functools

import jax
import jax.numpy as jnp
from jax import lax
from jax.experimental import pallas as pl
from jax.experimental.pallas import tpu as pltpu


# (kernel_size, padding, dilation) for PRIMITIVES_wo_act
_PRIMS = [
    (1, 0, 1),   # conv_1x1
    (3, 1, 1),   # conv_3x3
    (5, 2, 1),   # conv_5x5
    (3, 2, 2),   # dil_conv_3x3
    (5, 4, 2),   # dil_conv_5x5
]
_K = 9                    # fused kernel size (dil_conv_5x5 footprint)
_PAD = (_K - 1) // 2      # 4


def _prim_offsets(k, dil):
    c = (_K - 1) // 2
    return [c + dil * (j - (k - 1) // 2) for j in range(k)]


def _active_taps():
    taps = set()
    for (k, _, dil) in _PRIMS:
        offs = _prim_offsets(k, dil)
        taps.update((a, b) for a in offs for b in offs)
    return tuple(sorted(taps))      # 41 of the 81 (ky,kx) positions


# ---------------------------------------------------------------------------
# Pallas kernel: pure matmul + bias.  All window assembly happens wrapper-side.
# ---------------------------------------------------------------------------
def _mm_bias_kernel(lhs_ref, rhs_ref, b_ref, o_ref):
    # lhs_ref: (1, bm, Kc)  bf16   im2col rows for this (M-tile, Wo-tile)
    # rhs_ref: (Kc, Woc)    bf16   block-diagonal tap weight (VMEM-resident, constant index)
    # b_ref  : (1, Woc)     f32
    # o_ref  : (1, bm, Woc) consumer dtype
    acc = jnp.dot(lhs_ref[0], rhs_ref[...], preferred_element_type=jnp.float32)
    o_ref[0] = (acc + b_ref[...]).astype(o_ref.dtype)


def _pick_block_m(m):
    """Rows per grid step.  Prefer >=2 grid steps (pipelining + v7x megacore) while keeping
    per-step rows as large as possible; at production sizes this yields >=256 rows/step."""
    for bm in (512, 256, 128, 64, 32, 16, 8):
        if m % bm == 0 and m // bm >= 2:
            return bm
    return m


def _pick_wo_tile(wo, cin, cout, n_taps):
    """Largest divisor of Wo keeping wo_tile*Cout in ~128..512 lanes and the block-diagonal
    rhs small enough to sit resident in VMEM on every TPU generation."""
    best = 1
    for d in range(1, wo + 1):
        if wo % d:
            continue
        rhs_bytes = n_taps * d * cin * d * cout * 2     # bf16
        if d * cout <= 512 and rhs_bytes <= 8 * 1024 * 1024:
            best = d
    return best


def mixed_conv_pallas(lhs, rhs, b_tile, out_dtype, *, block_m):
    nwt, m, kc = lhs.shape
    kc2, woc = rhs.shape
    assert kc == kc2 and m % block_m == 0
    grid = (m // block_m, nwt)
    return pl.pallas_call(
        _mm_bias_kernel,
        out_shape=jax.ShapeDtypeStruct((nwt, m, woc), out_dtype),
        grid=grid,
        in_specs=[
            pl.BlockSpec((1, block_m, kc), lambda i, j: (j, i, 0)),
            pl.BlockSpec((kc, woc), lambda i, j: (0, 0)),     # constant -> stays resident
            pl.BlockSpec((1, woc), lambda i, j: (0, 0)),
        ],
        out_specs=pl.BlockSpec((1, block_m, woc), lambda i, j: (j, i, 0)),
        compiler_params=pltpu.CompilerParams(
            dimension_semantics=("parallel", "parallel"),
            vmem_limit_bytes=32 * 1024 * 1024,
        ),
    )(lhs, rhs, b_tile)


# ---------------------------------------------------------------------------
# Parameter init, spectral norm, alpha-mixing, weight packing (hoisted).
# ---------------------------------------------------------------------------
def _l2n(v, eps=1e-12):
    return v / (jnp.linalg.norm(v) + eps)


def spectral_normalize(w_oihw, key, n_iters=1):
    """PyTorch-style spectral norm (power iteration on W reshaped to (out, -1)).
    TODO(synk): PyTorch spectral_norm persists/updates the power-iteration vector u across
    forward calls; here a deterministic single iteration is applied at weight-build time."""
    out_ch = w_oihw.shape[0]
    wm = w_oihw.reshape(out_ch, -1)
    u = _l2n(jax.random.normal(key, (out_ch,), dtype=wm.dtype))
    v = _l2n(wm.T @ u)
    for _ in range(n_iters):
        v = _l2n(wm.T @ u)
        u = _l2n(wm @ v)
    sigma = u @ (wm @ v)
    return w_oihw / sigma


def make_params(key, in_ch, out_ch, sn=True):
    weights, biases = [], []
    for i, (k, _, _) in enumerate(_PRIMS):
        kw, kb, ku = jax.random.split(jax.random.fold_in(key, i), 3)
        fan_in = in_ch * k * k
        bound = 1.0 / (fan_in ** 0.5)
        w = jax.random.uniform(kw, (out_ch, in_ch, k, k), jnp.float32, -bound, bound)
        b = jax.random.uniform(kb, (out_ch,), jnp.float32, -bound, bound)
        if sn:
            w = spectral_normalize(w, ku, n_iters=1)
        weights.append(w)
        biases.append(b)
    return weights, biases


def pack_mixed_weight(weights_oihw, biases, alphas, taps):
    """alpha-mix all primitives into per-tap (Cin, Cout) weights + a single bias."""
    out_ch, in_ch = weights_oihw[0].shape[:2]
    tap_idx = {t: i for i, t in enumerate(taps)}
    wt = jnp.zeros((len(taps), in_ch, out_ch), jnp.float32)
    bias = jnp.zeros((out_ch,), jnp.float32)
    for alpha, w, b, (k, _, dil) in zip(alphas, weights_oihw, biases, _PRIMS):
        offs = _prim_offsets(k, dil)
        for a in range(k):
            for c in range(k):
                wt = wt.at[tap_idx[(offs[a], offs[c])]].add(alpha * w[:, :, a, c].T)
        bias = bias + alpha * b
    return wt, bias


def block_diag_weight(wt, wo_tile):
    """(T, Cin, Cout) -> (T*wo_tile*Cin, wo_tile*Cout): each tap's weight on a Wo-tile
    block diagonal, so the output stays lane-dense even at small Cout."""
    t, cin, cout = wt.shape
    eye = jnp.eye(wo_tile, dtype=wt.dtype)
    bd = jnp.einsum('tic,wv->twivc', wt, eye)          # (T, wo_tile, Cin, wo_tile, Cout)
    return bd.reshape(t * wo_tile * cin, wo_tile * cout)


def prepare_mixed_op(weights_oihw, biases, alphas, *, h, w, stride, cin, cout):
    """Hoisted packing: run once per (weights, alphas); NOT per forward call.
    TODO(synk): if alphas change every training step and Wo is large, build the block-diag
    layout inside the kernel (VMEM scratch) from the compact (T, Cin, Cout) weight instead."""
    taps = _active_taps()
    wt, bias = pack_mixed_weight(weights_oihw, biases, alphas, taps)
    wo = (w - 1) // stride + 1
    wo_tile = _pick_wo_tile(wo, cin, cout, len(taps))
    rhs = block_diag_weight(wt, wo_tile).astype(jnp.bfloat16)
    b_tile = jnp.tile(bias.astype(jnp.float32)[None, :], (1, wo_tile))   # (1, wo_tile*Cout)
    return {"rhs": rhs, "b_tile": b_tile, "wo_tile": wo_tile}


# ---------------------------------------------------------------------------
# Forward: wrapper-side im2col (active taps, stride folded in) + Pallas matmul.
# ---------------------------------------------------------------------------
@functools.partial(jax.jit, static_argnames=("stride", "wo_tile"))
def mixed_op_forward(x_nhwc, rhs_bd, b_tile, *, stride, wo_tile):
    n, h, w, cin = x_nhwc.shape
    cout = b_tile.shape[1] // wo_tile
    ho = (h - 1) // stride + 1
    wo = (w - 1) // stride + 1
    nwt = wo // wo_tile
    taps = _active_taps()
    t = len(taps)

    # Halo pad for the fused 9x9 footprint.
    xp = jnp.pad(x_nhwc, ((0, 0), (_PAD, _PAD), (_PAD, _PAD), (0, 0)))

    # Wrapper-side im2col over ACTIVE taps only, at strided output positions (stride folded
    # here, not by subsampling a full-res output).  Assembly in f32; one final cast to bf16.
    cols = []
    for (ky, kx) in taps:
        win = lax.slice(
            xp,
            (0, ky, kx, 0),
            (n, ky + stride * (ho - 1) + 1, kx + stride * (wo - 1) + 1, cin),
            (1, stride, stride, 1))                    # (N, Ho, Wo, Cin)
        cols.append(win)
    col = jnp.stack(cols, axis=0)                      # (T, N, Ho, Wo, Cin)
    col = col.reshape(t, n, ho, nwt, wo_tile, cin)
    lhs = jnp.transpose(col, (3, 1, 2, 0, 4, 5))       # (nwt, N, Ho, T, wo_tile, Cin)
    lhs = lhs.reshape(nwt, n * ho, t * wo_tile * cin).astype(jnp.bfloat16)

    block_m = _pick_block_m(n * ho)
    out = mixed_conv_pallas(lhs, rhs_bd, b_tile, x_nhwc.dtype, block_m=block_m)

    y = out.reshape(nwt, n, ho, wo_tile, cout)
    y = jnp.transpose(y, (1, 2, 0, 3, 4)).reshape(n, ho, wo, cout)
    return y


# ---------------------------------------------------------------------------
# Pure-JAX reference (per-primitive convs, summed in f32) for validation.
# ---------------------------------------------------------------------------
def reference_forward(x_nhwc, weights_oihw, biases, alphas, stride):
    out = None
    for alpha, w, b, (k, pad, dil) in zip(alphas, weights_oihw, biases, _PRIMS):
        w_hwio = jnp.transpose(w, (2, 3, 1, 0))
        y = lax.conv_general_dilated(
            x_nhwc, w_hwio,
            window_strides=(stride, stride),
            padding=[(pad, pad), (pad, pad)],
            rhs_dilation=(dil, dil),
            dimension_numbers=("NHWC", "HWIO", "NHWC"),
        ) + b
        out = alpha * y if out is None else out + alpha * y
    return out


if __name__ == "__main__":
    key = jax.random.PRNGKey(0)
    k_x, k_p, k_a = jax.random.split(key, 3)

    N, C_in, C_out, H, W = 2, 4, 8, 16, 16

    x = jax.random.normal(k_x, (N, C_in, H, W), jnp.float32)   # NCHW (PyTorch conv input)
    x_nhwc = jnp.transpose(x, (0, 2, 3, 1))                    # kernel layout: NHWC
    alphas = jax.nn.softmax(jax.random.normal(k_a, (5,), jnp.float32))
    weights, biases = make_params(k_p, C_in, C_out, sn=True)

    for stride in (1, 2):
        packed = prepare_mixed_op(weights, biases, alphas, h=H, w=W, stride=stride,
                                  cin=C_in, cout=C_out)
        out = jax.block_until_ready(
            mixed_op_forward(x_nhwc, packed["rhs"], packed["b_tile"],
                             stride=stride, wo_tile=packed["wo_tile"]))
        ref = jax.block_until_ready(
            reference_forward(x_nhwc, weights, biases, alphas, stride))
        assert out.shape == ref.shape, (stride, out.shape, ref.shape)
        max_err = float(jnp.max(jnp.abs(out - ref)))
        # bf16 MXU operands with f32 accumulation vs. a pure-f32 reference.
        assert jnp.allclose(out, ref, atol=3e-2, rtol=3e-2), (stride, max_err)

    print("KERNEL_OK")
</pallas_src>

<mosaic_0001>
module attributes {stable_mosaic.version = 11 : i64} {
  func.func @_mm_bias_kernel(%arg0: i32, %arg1: i32, %arg2: memref<1x16x2624xbf16, #tpu.memory_space<vmem>>, %arg3: memref<2624x128xbf16, #tpu.memory_space<vmem>>, %arg4: memref<1x128xf32, #tpu.memory_space<vmem>>, %arg5: memref<1x16x128xf32, #tpu.memory_space<vmem>>) attributes {dimension_semantics = [#tpu.dimension_semantics<parallel>, #tpu.dimension_semantics<parallel>], iteration_bounds = array<i64: 2, 1>, scalar_prefetch = 0 : i64, scratch_operands = 0 : i64, tpu.core_type = #tpu.core_type<tc>, window_params = [{transform_indices = @transform_0, window_bounds = array<i64: 1, 16, 2624>}, {pipeline_mode = #tpu.pipeline_mode<synchronous>, transform_indices = @transform_1, window_bounds = array<i64: 2624, 128>}, {pipeline_mode = #tpu.pipeline_mode<synchronous>, transform_indices = @transform_2, window_bounds = array<i64: 1, 128>}, {transform_indices = @transform_3, window_bounds = array<i64: 1, 16, 128>}]} {
    %c0 = arith.constant 0 : index
    %c0_0 = arith.constant 0 : index
    %c0_1 = arith.constant 0 : index
    %0 = vector.load %arg2[%c0, %c0_0, %c0_1] : memref<1x16x2624xbf16, #tpu.memory_space<vmem>>, vector<1x16x2624xbf16>
    %1 = vector.shape_cast %0 : vector<1x16x2624xbf16> to vector<16x2624xbf16>
    %c0_2 = arith.constant 0 : index
    %c0_3 = arith.constant 0 : index
    %2 = vector.load %arg3[%c0_2, %c0_3] : memref<2624x128xbf16, #tpu.memory_space<vmem>>, vector<2624x128xbf16>
    %cst = arith.constant dense<0.000000e+00> : vector<16x128xf32>
    %3 = tpu.matmul %1, %2, %cst {dimension_numbers = #tpu.dot_dimension_numbers<[1], [0], [0], [1], [0, 0, 1, 1], [], []>} : vector<16x2624xbf16>, vector<2624x128xbf16>, vector<16x128xf32> -> vector<16x128xf32>
    %c0_4 = arith.constant 0 : index
    %c0_5 = arith.constant 0 : index
    %4 = vector.load %arg4[%c0_4, %c0_5] : memref<1x128xf32, #tpu.memory_space<vmem>>, vector<1x128xf32>
    %5 = vector.broadcast %4 : vector<1x128xf32> to vector<16x128xf32>
    %6 = arith.addf %3, %5 : vector<16x128xf32>
    %c0_6 = arith.constant 0 : index
    %c0_7 = arith.constant 0 : index
    %c0_8 = arith.constant 0 : index
    %7 = vector.load %arg5[%c0_6, %c0_7, %c0_8] : memref<1x16x128xf32, #tpu.memory_space<vmem>>, vector<1x16x128xf32>
    %8 = vector.shape_cast %7 : vector<1x16x128xf32> to vector<16x128xf32>
    %9 = vector.shape_cast %6 : vector<16x128xf32> to vector<1x16x128xf32>
    tpu.vector_store %arg5[%c0_6, %c0_7, %c0_8], %9 {strides = array<i32>} : memref<1x16x128xf32, #tpu.memory_space<vmem>>, vector<1x16x128xf32>,
    return
  }
  func.func @transform_0(%arg0: i32, %arg1: i32) -> (i32, i32, i32) {
    %c0_i32 = arith.constant 0 : i32
    %c0_i32_0 = arith.constant 0 : i32
    return %arg1, %arg0, %c0_i32 : i32, i32, i32
  }
  func.func @transform_1(%arg0: i32, %arg1: i32) -> (i32, i32) {
    %c0_i32 = arith.constant 0 : i32
    %c0_i32_0 = arith.constant 0 : i32
    %c0_i32_1 = arith.constant 0 : i32
    return %c0_i32, %c0_i32_0 : i32, i32
  }
  func.func @transform_2(%arg0: i32, %arg1: i32) -> (i32, i32) {
    %c0_i32 = arith.constant 0 : i32
    %c0_i32_0 = arith.constant 0 : i32
    %c0_i32_1 = arith.constant 0 : i32
    return %c0_i32, %c0_i32_0 : i32, i32
  }
  func.func @transform_3(%arg0: i32, %arg1: i32) -> (i32, i32, i32) {
    %c0_i32 = arith.constant 0 : i32
    %c0_i32_0 = arith.constant 0 : i32
    return %arg1, %arg0, %c0_i32 : i32, i32, i32
  }
}

</mosaic_0001>

<bundles_post_ra>
// kernel: mixed_op_forward.1
= control target key start
LH: loop header
LB: loop body
LE: loop exit
PB: predicated region body
PF: predicated region fallthrough
CT: control target
= control target key end

     0   :  { %s3054_s12 = smov 0   ;;  %s3056_s13 = smov 0   ;;  %s3633_s0 = inlined_call_operand.vmem [shape: bf16[1,32,2624], index: 0, kind: input, shape index: {}]   ;;  %s3634_s1 = inlined_call_operand.vmem [shape: bf16[2624,128], index: 1, kind: input, shape index: {}]   ;;  %s3635_s2 = inlined_call_operand.vmem [shape: f32[1,128], index: 2, kind: input, shape index: {}]   ;;  %s3636_s3 = inlined_call_operand.vmem [shape: f32[1,32,128], index: 3, kind: output, shape index: {}]  }
   0x1   :  { %s3058_s14 = smov 0  }
   0x2 LB: > { %s25_s15 = sadd.s32 1, %s3028_s13  ;;  %p2051_p0 = scmp.ge.s32.totalorder %s3032_s14, 1  ;;  %s3032_s14 = sphi %s3058_s14, %s13_s14   ;;  %s3028_s13 = sphi %s3056_s13, %s3638_s13   ;;  %s3024_s12 = sphi %s3054_s12, %s3637_s12  }
   0x3   : > { %p27_p1 = scmp.ge.s32.totalorder %s25_s15, 2  ;;  %p159_p2 = scmp.lt.s32.totalorder %s3032_s14, 3 }
   0x5   : > { %s3640_s15 = smov (%p27_p1, %s25_s15), 0  ;;  %p160_p3 = pnand %p2051_p0, %p159_p2 }
   0x6   : > { %s2052_s17 = sshll.u32 (!%p160_p3), %s3024_s12, 1 }
   0x7   : > { %163 = sbr.rel (%p160_p3) target bundleno = 325 (0x145), region = 32  ;;  %p195_p4 = scmp.lt.s32.totalorder (!%p160_p3), %s2052_s17, 3 }
   0xc   : > { %v2827_v0 = vld [vmem:[%s3634_s1 + $0x38] sm:$0xff]  ;;  %v2826_v4 = vld [vmem:[%s3634_s1 + $0x30] sm:$0xff]  ;;  %v2825_v8 = vld [vmem:[%s3634_s1 + $0x28] sm:$0xff]  ;;  %s3642_s17 = smov (!%p195_p4, %s2052_s17), 3  ;;  %vm1657_vm0 = vcmask 523264  }
   0xd   : > { %v2843_v1 = vld [vmem:[%s3634_s1 + $0xb8] sm:$0xff]  ;;  %1661 = vmatpush.bf16.msra.mxu0 %v2827_v0  ;;  %v2842_v5 = vld [vmem:[%s3634_s1 + $0xb0] sm:$0xff]  ;;  %v2841_v9 = vld [vmem:[%s3634_s1 + $0xa8] sm:$0xff]  ;;  %s2984_s19 = smul.u32 84, %s3642_s17 }
   0xe   : > { %v2851_v2 = vld [vmem:[%s3634_s1 + $0xf8] sm:$0xff]  ;;  %1689 = vmatpush.bf16.msra.mxu2 %v2843_v1  ;;  %v2850_v6 = vld [vmem:[%s3634_s1 + $0xf0] sm:$0xff]  ;;  %v2849_v10 = vld [vmem:[%s3634_s1 + $0xe8] sm:$0xff] }
   0xf   : > { %v2835_v3 = vld [vmem:[%s3634_s1 + $0x78] sm:$0xff]  ;;  %1703 = vmatpush.bf16.msra.mxu3 %v2851_v2  ;;  %v2834_v7 = vld [vmem:[%s3634_s1 + $0x70] sm:$0xff]  ;;  %v2833_v11 = vld [vmem:[%s3634_s1 + $0x68] sm:$0xff]  ;;  %s3165_s29 = scalar_lea.vmem %s3633_s0, %s2984_s19 }
  0x10   : > { %1675 = vmatpush.bf16.msra.mxu1 %v2835_v3  ;;  %v2824_v12 = vld [vmem:[%s3634_s1 + $0x20] sm:$0xff]  ;;  %v2823_v16 = vld [vmem:[%s3634_s1 + $0x18] sm:$0xff]  ;;  %v2822_v20 = vld [vmem:[%s3634_s1 + $0x10] sm:$0xff] }
  0x11   : > { %1662 = vmatpush.bf16.msra.mxu0 %v2826_v4  ;;  %v2840_v13 = vld [vmem:[%s3634_s1 + $0xa0] sm:$0xff]  ;;  %v2839_v17 = vld [vmem:[%s3634_s1 + $0x98] sm:$0xff]  ;;  %v2838_v21 = vld [vmem:[%s3634_s1 + $0x90] sm:$0xff] }
  0x12   : > { %1690 = vmatpush.bf16.msra.mxu2 %v2842_v5  ;;  %v2848_v14 = vld [vmem:[%s3634_s1 + $0xe0] sm:$0xff]  ;;  %v2847_v18 = vld [vmem:[%s3634_s1 + $0xd8] sm:$0xff]  ;;  %v2846_v22 = vld [vmem:[%s3634_s1 + $0xd0] sm:$0xff] }
  0x13   : > { %1704 = vmatpush.bf16.msra.mxu3 %v2850_v6  ;;  %v2832_v15 = vld [vmem:[%s3634_s1 + $0x60] sm:$0xff]  ;;  %v2831_v19 = vld [vmem:[%s3634_s1 + $0x58] sm:$0xff]  ;;  %v2830_v23 = vld [vmem:[%s3634_s1 + $0x50] sm:$0xff] }
  0x14   : > { %1676 = vmatpush.bf16.msra.mxu1 %v2834_v7  ;;  %v2821_v24 = vld [vmem:[%s3634_s1 + $0x8] sm:$0xff]  ;;  %v2820_v28 = vld [vmem:[%s3634_s1] sm:$0xff]  ;;  %v2859_v31 = vld [vmem:[%s3634_s1 + $0x138] sm:$0xff] }
  0x15   : > { %1663 = vmatpush.bf16.msra.mxu0 %v2825_v8  ;;  %v2837_v25 = vld [vmem:[%s3634_s1 + $0x88] sm:$0xff]  ;;  %v2836_v29 = vld [vmem:[%s3634_s1 + $0x80] sm:$0xff]  ;;  %v2809_v33 = vld [vmem:[%s3165_s29 + $0x50] sm:$0xf0] }
  0x16   : > { %1691 = vmatpush.bf16.msra.mxu2 %v2841_v9  ;;  %v2845_v26 = vld [vmem:[%s3634_s1 + $0xc8] sm:$0xff]  ;;  %v2844_v30 = vld [vmem:[%s3634_s1 + $0xc0] sm:$0xff]  ;;  %v2875_v34 = vld [vmem:[%s3634_s1 + $0x1b8] sm:$0xff] }
  0x17   : > { %1705 = vmatpush.bf16.msra.mxu3 %v2849_v10  ;;  %v2829_v27 = vld [vmem:[%s3634_s1 + $0x48] sm:$0xff]  ;;  %v2058_v32 = vld [vmem:[%s3165_s29] sm:$0xf]  ;;  %v2810_v36 = vld [vmem:[%s3165_s29 + $0x58] sm:$0xf0] }
  0x18   : > { %1677 = vmatpush.bf16.msra.mxu1 %v2833_v11  ;;  %v2066_v35 = vld [vmem:[%s3165_s29 + $0x8] sm:$0xf]  ;;  %v2883_v37 = vld [vmem:[%s3634_s1 + $0x1f8] sm:$0xff]  ;;  %v2800_v38 = vld [vmem:[%s3165_s29 + $0xc] sm:$0xf]  ;;  %v2059_v41 = vor.u32 %v2809_v33, %v2058_v32 }
  0x19   : > { %1664 = vmatpush.bf16.msra.mxu0 %v2824_v12  ;;  %v2068_v39 = vld [vmem:[%s3165_s29 + $0x5c] sm:$0xf0]  ;;  %v2867_v42 = vld [vmem:[%s3634_s1 + $0x178] sm:$0xff]  ;;  %v2067_v43 = vor.u32 %v2810_v36, %v2066_v35  ;;  %v2799_v44 = vld [vmem:[%s3165_s29 + $0x4] sm:$0xf] }
  0x1a   : > { %1692 = vmatpush.bf16.msra.mxu2 %v2840_v13  ;;  %v2828_v40 = vld [vmem:[%s3634_s1 + $0x40] sm:$0xff]  ;;  %v2060_v45 = vld [vmem:[%s3165_s29 + $0x54] sm:$0xf0]  ;;  %v2858_v46 = vld [vmem:[%s3634_s1 + $0x130] sm:$0xff]  ;;  %v2071_v47 = vor.u32 %v2800_v38, %v2068_v39 }
  0x1b   : > { %1706 = vmatpush.bf16.msra.mxu3 %v2848_v14  ;;  %v2874_v48 = vld [vmem:[%s3634_s1 + $0x1b0] sm:$0xff]  ;;  %v2063_v50 = vor.u32 %v2799_v44, %v2060_v45  ;;  %v2857_v52 = vld [vmem:[%s3634_s1 + $0x128] sm:$0xff]  ;;  %v2856_v56 = vld [vmem:[%s3634_s1 + $0x120] sm:$0xff] }
  0x1c   : > { %1678 = vmatpush.bf16.msra.mxu1 %v2832_v15  ;;  %v2882_v49 = vld [vmem:[%s3634_s1 + $0x1f0] sm:$0xff]  ;;  %v2873_v53 = vld [vmem:[%s3634_s1 + $0x1a8] sm:$0xff]  ;;  %v2872_v57 = vld [vmem:[%s3634_s1 + $0x1a0] sm:$0xff] }
  0x1d   : > { %1665 = vmatpush.bf16.msra.mxu0 %v2823_v16  ;;  %v2866_v51 = vld [vmem:[%s3634_s1 + $0x170] sm:$0xff]  ;;  %v2881_v54 = vld [vmem:[%s3634_s1 + $0x1e8] sm:$0xff]  ;;  %v2880_v58 = vld [vmem:[%s3634_s1 + $0x1e0] sm:$0xff] }
  0x1e   : > { %1693 = vmatpush.bf16.msra.mxu2 %v2839_v17  ;;  %v2865_v55 = vld [vmem:[%s3634_s1 + $0x168] sm:$0xff]  ;;  %v2864_v59 = vld [vmem:[%s3634_s1 + $0x160] sm:$0xff]  ;;  %v2855_v60 = vld [vmem:[%s3634_s1 + $0x118] sm:$0xff] }
  0x1f   : > { %1707 = vmatpush.bf16.msra.mxu3 %v2847_v18  ;;  %v2871_v61 = vld [vmem:[%s3634_s1 + $0x198] sm:$0xff]  ;;  %v2854_v0 = vld [vmem:[%s3634_s1 + $0x110] sm:$0xff]  ;;  %v2853_v4 = vld [vmem:[%s3634_s1 + $0x108] sm:$0xff] }
  0x20   : > { %1679 = vmatpush.bf16.msra.mxu1 %v2831_v19  ;;  %v2879_v62 = vld [vmem:[%s3634_s1 + $0x1d8] sm:$0xff]  ;;  %v2870_v1 = vld [vmem:[%s3634_s1 + $0x190] sm:$0xff]  ;;  %v2869_v5 = vld [vmem:[%s3634_s1 + $0x188] sm:$0xff] }
  0x21   : > { %1666 = vmatpush.bf16.msra.mxu0 %v2822_v20  ;;  %v2863_v63 = vld [vmem:[%s3634_s1 + $0x158] sm:$0xff]  ;;  %v2878_v2 = vld [vmem:[%s3634_s1 + $0x1d0] sm:$0xff]  ;;  %v2877_v6 = vld [vmem:[%s3634_s1 + $0x1c8] sm:$0xff] }
  0x22   : > { %1694 = vmatpush.bf16.msra.mxu2 %v2838_v21  ;;  %v2862_v3 = vld [vmem:[%s3634_s1 + $0x150] sm:$0xff]  ;;  %v2861_v7 = vld [vmem:[%s3634_s1 + $0x148] sm:$0xff]  ;;  %v2852_v8 = vld [vmem:[%s3634_s1 + $0x100] sm:$0xff] }
  0x23   : > { %1708 = vmatpush.bf16.msra.mxu3 %v2846_v22  ;;  %v2868_v9 = vld [vmem:[%s3634_s1 + $0x180] sm:$0xff]  ;;  %v2891_v11 = vld [vmem:[%s3634_s1 + $0x238] sm:$0xff]  ;;  %v2074_v13 = vld [vmem:[%s3165_s29 + $0x10] sm:$0xf] }
  0x24   : > { %1680 = vmatpush.bf16.msra.mxu1 %v2830_v23  ;;  %v2876_v10 = vld [vmem:[%s3634_s1 + $0x1c0] sm:$0xff]  ;;  %v2907_v12 = vld [vmem:[%s3634_s1 + $0x2b8] sm:$0xff]  ;;  %v2812_v16 = vld [vmem:[%s3165_s29 + $0x68] sm:$0xf0] }
  0x25   : > { %1667 = vmatpush.bf16.msra.mxu0 %v2821_v24  ;;  %v2811_v14 = vld [vmem:[%s3165_s29 + $0x60] sm:$0xf0]  ;;  %v2082_v15 = vld [vmem:[%s3165_s29 + $0x18] sm:$0xf]  ;;  %v2802_v18 = vld [vmem:[%s3165_s29 + $0x1c] sm:$0xf] }
  0x26   : > { %1695 = vmatpush.bf16.msra.mxu2 %v2837_v25  ;;  %v2915_v17 = vld [vmem:[%s3634_s1 + $0x2f8] sm:$0xff]  ;;  %v2084_v19 = vld [vmem:[%s3165_s29 + $0x6c] sm:$0xf0]  ;;  %v2860_v20 = vld [vmem:[%s3634_s1 + $0x140] sm:$0xff]  ;;  %v2075_v23 = vor.u32 %v2811_v14, %v2074_v13  ;;  %v2083_v24 = vor.u32 %v2812_v16, %v2082_v15 }
  0x27   : > { %1709 = vmatpush.bf16.msra.mxu3 %v2845_v26  ;;  %v2801_v21 = vld [vmem:[%s3165_s29 + $0x14] sm:$0xf]  ;;  %v2076_v22 = vld [vmem:[%s3165_s29 + $0x64] sm:$0xf0]  ;;  %v2899_v25 = vld [vmem:[%s3634_s1 + $0x278] sm:$0xff]  ;;  %v2087_v26 = vor.u32 %v2802_v18, %v2084_v19 }
  0x28   : > { %1681 = vmatpush.bf16.msra.mxu1 %v2829_v27  ;;  %v2079_v27 = vor.u32 %v2801_v21, %v2076_v22  ;;  %v2889_v32 = vld [vmem:[%s3634_s1 + $0x228] sm:$0xff]  ;;  %v2888_v36 = vld [vmem:[%s3634_s1 + $0x220] sm:$0xff]  ;;  %v2886_v44 = vld [vmem:[%s3634_s1 + $0x210] sm:$0xff] }
  0x29   : > { %1668 = vmatpush.bf16.msra.mxu0 %v2820_v28  ;;  %v2890_v28 = vld [vmem:[%s3634_s1 + $0x230] sm:$0xff]  ;;  %v2905_v33 = vld [vmem:[%s3634_s1 + $0x2a8] sm:$0xff]  ;;  %v2912_v38 = vld [vmem:[%s3634_s1 + $0x2e0] sm:$0xff] }
  0x2a   : > { %1696 = vmatpush.bf16.msra.mxu2 %v2836_v29  ;;  %v2906_v29 = vld [vmem:[%s3634_s1 + $0x2b0] sm:$0xff]  ;;  %v2897_v35 = vld [vmem:[%s3634_s1 + $0x268] sm:$0xff]  ;;  %v2896_v39 = vld [vmem:[%s3634_s1 + $0x260] sm:$0xff] }
  0x2b   : > { %1710 = vmatpush.bf16.msra.mxu3 %v2844_v30  ;;  %v2914_v30 = vld [vmem:[%s3634_s1 + $0x2f0] sm:$0xff]  ;;  %v2937_v13 = vld [vmem:[%s3634_s1 + $0x3a8] sm:$0xff]  ;;  %v2920_v16 = vld [vmem:[%s3634_s1 + $0x320] sm:$0xff] }
  0x2c   : > { %1682 = vmatpush.bf16.msra.mxu1 %v2828_v40  ;;  %1669 = vmatmul.bf16.vlgmr.msra.gmra.mxu0 %v2059_v41  ;;  %v2887_v40 = vld [vmem:[%s3634_s1 + $0x218] sm:$0xff]  ;;  %v2902_v45 = vld [vmem:[%s3634_s1 + $0x290] sm:$0xff]  ;;  %v2945_v14 = vld [vmem:[%s3634_s1 + $0x3e8] sm:$0xff] }
  0x2d   : > { %1717 = vmatpush.bf16.msrb.mxu0 %v2859_v31  ;;  %1697 = vmatmul.bf16.vlgmr.msra.gmra.mxu2 %v2067_v43  ;;  %v2898_v31 = vld [vmem:[%s3634_s1 + $0x270] sm:$0xff]  ;;  %v2903_v41 = vld [vmem:[%s3634_s1 + $0x298] sm:$0xff]  ;;  %v2929_v15 = vld [vmem:[%s3634_s1 + $0x368] sm:$0xff] }
  0x2e   : > { %1745 = vmatpush.bf16.msrb.mxu2 %v2875_v34  ;;  %1711 = vmatmul.bf16.vlgmr.msra.gmra.mxu3 %v2071_v47  ;;  %v2913_v34 = vld [vmem:[%s3634_s1 + $0x2e8] sm:$0xff]  ;;  %v2895_v43 = vld [vmem:[%s3634_s1 + $0x258] sm:$0xff]  ;;  %v2894_v47 = vld [vmem:[%s3634_s1 + $0x250] sm:$0xff] }
  0x2f   : > { %1759 = vmatpush.bf16.msrb.mxu3 %v2883_v37  ;;  %1683 = vmatmul.bf16.vlgmr.msra.gmra.mxu1 %v2063_v50  ;;  %v2904_v37 = vld [vmem:[%s3634_s1 + $0x2a0] sm:$0xff]  ;;  %v2909_v50 = vld [vmem:[%s3634_s1 + $0x2c8] sm:$0xff]  ;;  %v2935_v21 = vld [vmem:[%s3634_s1 + $0x398] sm:$0xff] }
  0x30   : > { %1731 = vmatpush.bf16.msrb.mxu1 %v2867_v42  ;;  %v2911_v42 = vld [vmem:[%s3634_s1 + $0x2d8] sm:$0xff]  ;;  %v2944_v18 = vld [vmem:[%s3634_s1 + $0x3e0] sm:$0xff] }
  0x31   : > { %1718 = vmatpush.bf16.msrb.mxu0 %v2858_v46  ;;  %v2910_v46 = vld [vmem:[%s3634_s1 + $0x2d0] sm:$0xff]  ;;  %v2928_v19 = vld [vmem:[%s3634_s1 + $0x360] sm:$0xff]  ;;  %v2943_v22 = vld [vmem:[%s3634_s1 + $0x3d8] sm:$0xff] }
  0x32   : > { %1746 = vmatpush.bf16.msrb.mxu2 %v2874_v48  ;;  %v2885_v48 = vld [vmem:[%s3634_s1 + $0x208] sm:$0xff] }
  0x33   : > { %1760 = vmatpush.bf16.msrb.mxu3 %v2882_v49  ;;  %v2901_v49 = vld [vmem:[%s3634_s1 + $0x288] sm:$0xff] }
  0x34   : > { %1732 = vmatpush.bf16.msrb.mxu1 %v2866_v51  ;;  %v2893_v51 = vld [vmem:[%s3634_s1 + $0x248] sm:$0xff] }
  0x35   : > { %1719 = vmatpush.bf16.msrb.mxu0 %v2857_v52  ;;  %v2884_v52 = vld [vmem:[%s3634_s1 + $0x200] sm:$0xff] }
  0x36   : > { %1747 = vmatpush.bf16.msrb.mxu2 %v2873_v53  ;;  %v2900_v53 = vld [vmem:[%s3634_s1 + $0x280] sm:$0xff] }
  0x37   : > { %1761 = vmatpush.bf16.msrb.mxu3 %v2881_v54  ;;  %v2908_v54 = vld [vmem:[%s3634_s1 + $0x2c0] sm:$0xff] }
  0x38   : > { %1733 = vmatpush.bf16.msrb.mxu1 %v2865_v55  ;;  %v2923_v55 = vld [vmem:[%s3634_s1 + $0x338] sm:$0xff] }
  0x39   : > { %1720 = vmatpush.bf16.msrb.mxu0 %v2856_v56  ;;  %v2939_v56 = vld [vmem:[%s3634_s1 + $0x3b8] sm:$0xff] }
  0x3a   : > { %1748 = vmatpush.bf16.msrb.mxu2 %v2872_v57  ;;  %v2090_v57 = vld [vmem:[%s3165_s29 + $0x20] sm:$0xf] }
  0x3b   : > { %1762 = vmatpush.bf16.msrb.mxu3 %v2880_v58  ;;  %v2813_v58 = vld [vmem:[%s3165_s29 + $0x70] sm:$0xf0] }
  0x3c   : > { %1734 = vmatpush.bf16.msrb.mxu1 %v2864_v59  ;;  %v2098_v59 = vld [vmem:[%s3165_s29 + $0x28] sm:$0xf] }
  0x3d   : > { %1721 = vmatpush.bf16.msrb.mxu0 %v2855_v60  ;;  %v2814_v60 = vld [vmem:[%s3165_s29 + $0x78] sm:$0xf0] }
  0x3e   : > { %1749 = vmatpush.bf16.msrb.mxu2 %v2871_v61  ;;  %v2947_v61 = vld [vmem:[%s3634_s1 + $0x3f8] sm:$0xff] }
  0x3f   : > { %1763 = vmatpush.bf16.msrb.mxu3 %v2879_v62  ;;  %v2804_v62 = vld [vmem:[%s3165_s29 + $0x2c] sm:$0xf] }
  0x40   : > { %1735 = vmatpush.bf16.msrb.mxu1 %v2863_v63  ;;  %v2100_v63 = vld [vmem:[%s3165_s29 + $0x7c] sm:$0xf0] }
  0x41   : > { %1722 = vmatpush.bf16.msrb.mxu0 %v2854_v0  ;;  %v2892_v0 = vld [vmem:[%s3634_s1 + $0x240] sm:$0xff] }
  0x42   : > { %1750 = vmatpush.bf16.msrb.mxu2 %v2870_v1  ;;  %v2803_v1 = vld [vmem:[%s3165_s29 + $0x24] sm:$0xf] }
  0x43   : > { %1764 = vmatpush.bf16.msrb.mxu3 %v2878_v2  ;;  %v2092_v2 = vld [vmem:[%s3165_s29 + $0x74] sm:$0xf0] }
  0x44   : > { %1736 = vmatpush.bf16.msrb.mxu1 %v2862_v3  ;;  %v2091_v3 = vor.u32 %v2813_v58, %v2090_v57  ;;  %v2969_v57 = vld [vmem:[%s3634_s1 + $0x4a8] sm:$0xff] }
  0x45   : > { %1723 = vmatpush.bf16.msrb.mxu0 %v2853_v4  ;;  %v2099_v4 = vor.u32 %v2814_v60, %v2098_v59  ;;  %v2977_v58 = vld [vmem:[%s3634_s1 + $0x4e8] sm:$0xff]  ;;  %v2952_v60 = vld [vmem:[%s3634_s1 + $0x420] sm:$0xff] }
  0x46   : > { %1751 = vmatpush.bf16.msrb.mxu2 %v2869_v5  ;;  %v2931_v5 = vld [vmem:[%s3634_s1 + $0x378] sm:$0xff]  ;;  %v2961_v59 = vld [vmem:[%s3634_s1 + $0x468] sm:$0xff] }
  0x47   : > { %1765 = vmatpush.bf16.msrb.mxu3 %v2877_v6  ;;  %v2103_v6 = vor.u32 %v2804_v62, %v2100_v63  ;;  %v2976_v62 = vld [vmem:[%s3634_s1 + $0x4e0] sm:$0xff] }
  0x48   : > { %1737 = vmatpush.bf16.msrb.mxu1 %v2861_v7  ;;  %v2095_v7 = vor.u32 %v2803_v1, %v2092_v2  ;;  %v2960_v63 = vld [vmem:[%s3634_s1 + $0x460] sm:$0xff]  ;;  %v2967_v1 = vld [vmem:[%s3634_s1 + $0x498] sm:$0xff] }
  0x49   : > { %1724 = vmatpush.bf16.msrb.mxu0 %v2852_v8  ;;  %v2922_v8 = vld [vmem:[%s3634_s1 + $0x330] sm:$0xff]  ;;  %v2975_v2 = vld [vmem:[%s3634_s1 + $0x4d8] sm:$0xff] }
  0x4a   : > { %1752 = vmatpush.bf16.msrb.mxu2 %v2868_v9  ;;  %v2938_v9 = vld [vmem:[%s3634_s1 + $0x3b0] sm:$0xff] }
  0x4b   : > { %1766 = vmatpush.bf16.msrb.mxu3 %v2876_v10  ;;  %v2946_v10 = vld [vmem:[%s3634_s1 + $0x3f0] sm:$0xff] }
  0x4c   : > { %1738 = vmatpush.bf16.msrb.mxu1 %v2860_v20  ;;  %1725 = vmatmul.bf16.vlgmr.msrb.gmra.mxu0 %v2075_v23  ;;  %v2919_v20 = vld [vmem:[%s3634_s1 + $0x318] sm:$0xff] }
  0x4d   : > { %1773 = vmatpush.bf16.msra.mxu0 %v2891_v11  ;;  %1753 = vmatmul.bf16.vlgmr.msrb.gmra.mxu2 %v2083_v24  ;;  %v2930_v11 = vld [vmem:[%s3634_s1 + $0x370] sm:$0xff]  ;;  %v2927_v23 = vld [vmem:[%s3634_s1 + $0x358] sm:$0xff] }
  0x4e   : > { %1801 = vmatpush.bf16.msra.mxu2 %v2907_v12  ;;  %1767 = vmatmul.bf16.vlgmr.msrb.gmra.mxu3 %v2087_v26  ;;  %v2921_v12 = vld [vmem:[%s3634_s1 + $0x328] sm:$0xff]  ;;  %v2918_v24 = vld [vmem:[%s3634_s1 + $0x310] sm:$0xff] }
  0x4f   : > { %1815 = vmatpush.bf16.msra.mxu3 %v2915_v17  ;;  %1739 = vmatmul.bf16.vlgmr.msrb.gmra.mxu1 %v2079_v27  ;;  %v2936_v17 = vld [vmem:[%s3634_s1 + $0x3a0] sm:$0xff]  ;;  %v2942_v26 = vld [vmem:[%s3634_s1 + $0x3d0] sm:$0xff] }
  0x50   : > { %1787 = vmatpush.bf16.msra.mxu1 %v2899_v25  ;;  %v2934_v25 = vld [vmem:[%s3634_s1 + $0x390] sm:$0xff] }
  0x51   : > { %1774 = vmatpush.bf16.msra.mxu0 %v2890_v28  ;;  %v2926_v27 = vld [vmem:[%s3634_s1 + $0x350] sm:$0xff]  ;;  %v2917_v28 = vld [vmem:[%s3634_s1 + $0x308] sm:$0xff] }
  0x52   : > { %1802 = vmatpush.bf16.msra.mxu2 %v2906_v29  ;;  %v2933_v29 = vld [vmem:[%s3634_s1 + $0x388] sm:$0xff] }
  0x53   : > { %1816 = vmatpush.bf16.msra.mxu3 %v2914_v30  ;;  %v2941_v30 = vld [vmem:[%s3634_s1 + $0x3c8] sm:$0xff] }
  0x54   : > { %1788 = vmatpush.bf16.msra.mxu1 %v2898_v31  ;;  %v2925_v31 = vld [vmem:[%s3634_s1 + $0x348] sm:$0xff] }
  0x55   : > { %1775 = vmatpush.bf16.msra.mxu0 %v2889_v32  ;;  %v2916_v32 = vld [vmem:[%s3634_s1 + $0x300] sm:$0xff] }
  0x56   : > { %1803 = vmatpush.bf16.msra.mxu2 %v2905_v33  ;;  %v2932_v33 = vld [vmem:[%s3634_s1 + $0x380] sm:$0xff] }
  0x57   : > { %1817 = vmatpush.bf16.msra.mxu3 %v2913_v34  ;;  %v2940_v34 = vld [vmem:[%s3634_s1 + $0x3c0] sm:$0xff] }
  0x58   : > { %1789 = vmatpush.bf16.msra.mxu1 %v2897_v35  ;;  %v2955_v35 = vld [vmem:[%s3634_s1 + $0x438] sm:$0xff] }
  0x59   : > { %1776 = vmatpush.bf16.msra.mxu0 %v2888_v36  ;;  %v2971_v36 = vld [vmem:[%s3634_s1 + $0x4b8] sm:$0xff] }
  0x5a   : > { %1804 = vmatpush.bf16.msra.mxu2 %v2904_v37  ;;  %v2106_v37 = vld [vmem:[%s3165_s29 + $0x30] sm:$0xf] }
  0x5b   : > { %1818 = vmatpush.bf16.msra.mxu3 %v2912_v38  ;;  %v2815_v38 = vld [vmem:[%s3165_s29 + $0x80] sm:$0xf0] }
  0x5c   : > { %1790 = vmatpush.bf16.msra.mxu1 %v2896_v39  ;;  %v2114_v39 = vld [vmem:[%s3165_s29 + $0x38] sm:$0xf] }
  0x5d   : > { %1777 = vmatpush.bf16.msra.mxu0 %v2887_v40  ;;  %v2816_v40 = vld [vmem:[%s3165_s29 + $0x88] sm:$0xf0] }
  0x5e   : > { %1805 = vmatpush.bf16.msra.mxu2 %v2903_v41  ;;  %v2979_v41 = vld [vmem:[%s3634_s1 + $0x4f8] sm:$0xff] }
  0x5f   : > { %1819 = vmatpush.bf16.msra.mxu3 %v2911_v42  ;;  %v2806_v42 = vld [vmem:[%s3165_s29 + $0x3c] sm:$0xf] }
  0x60   : > { %1791 = vmatpush.bf16.msra.mxu1 %v2895_v43  ;;  %v2116_v43 = vld [vmem:[%s3165_s29 + $0x8c] sm:$0xf0] }
  0x61   : > { %1778 = vmatpush.bf16.msra.mxu0 %v2886_v44  ;;  %v2924_v44 = vld [vmem:[%s3634_s1 + $0x340] sm:$0xff] }
  0x62   : > { %1806 = vmatpush.bf16.msra.mxu2 %v2902_v45  ;;  %v2805_v45 = vld [vmem:[%s3165_s29 + $0x34] sm:$0xf] }
  0x63   : > { %1820 = vmatpush.bf16.msra.mxu3 %v2910_v46  ;;  %v2108_v46 = vld [vmem:[%s3165_s29 + $0x84] sm:$0xf0] }
  0x64   : > { %1792 = vmatpush.bf16.msra.mxu1 %v2894_v47  ;;  %v2107_v47 = vor.u32 %v2815_v38, %v2106_v37 }
  0x65   : > { %1779 = vmatpush.bf16.msra.mxu0 %v2885_v48  ;;  %v2115_v48 = vor.u32 %v2816_v40, %v2114_v39 }
  0x66   : > { %1807 = vmatpush.bf16.msra.mxu2 %v2901_v49  ;;  %v2963_v49 = vld [vmem:[%s3634_s1 + $0x478] sm:$0xff] }
  0x67   : > { %1821 = vmatpush.bf16.msra.mxu3 %v2909_v50  ;;  %v2119_v50 = vor.u32 %v2806_v42, %v2116_v43  ;;  %v3009_v43 = vld [vmem:[%s3635_s2] ss:$0 sm:$0xff] }
  0x68   : > { %1793 = vmatpush.bf16.msra.mxu1 %v2893_v51  ;;  %v2111_v51 = vor.u32 %v2805_v45, %v2108_v46 }
  0x69   : > { %1780 = vmatpush.bf16.msra.mxu0 %v2884_v52  ;;  %v2954_v52 = vld [vmem:[%s3634_s1 + $0x430] sm:$0xff] }
  0x6a   : > { %1808 = vmatpush.bf16.msra.mxu2 %v2900_v53  ;;  %v2970_v53 = vld [vmem:[%s3634_s1 + $0x4b0] sm:$0xff] }
  0x6b   : > { %1822 = vmatpush.bf16.msra.mxu3 %v2908_v54  ;;  %v2978_v54 = vld [vmem:[%s3634_s1 + $0x4f0] sm:$0xff] }
  0x6c   : > { %1794 = vmatpush.bf16.msra.mxu1 %v2892_v0  ;;  %1781 = vmatmul.bf16.vlgmr.msra.gmra.mxu0 %v2091_v3  ;;  %v2951_v0 = vld [vmem:[%s3634_s1 + $0x418] sm:$0xff] }
  0x6d   : > { %1829 = vmatpush.bf16.msrb.mxu0 %v2923_v55  ;;  %1809 = vmatmul.bf16.vlgmr.msra.gmra.mxu2 %v2099_v4  ;;  %v2962_v55 = vld [vmem:[%s3634_s1 + $0x470] sm:$0xff]  ;;  %v2959_v3 = vld [vmem:[%s3634_s1 + $0x458] sm:$0xff] }
  0x6e   : > { %1857 = vmatpush.bf16.msrb.mxu2 %v2939_v56  ;;  %1823 = vmatmul.bf16.vlgmr.msra.gmra.mxu3 %v2103_v6  ;;  %v2953_v56 = vld [vmem:[%s3634_s1 + $0x428] sm:$0xff]  ;;  %v2950_v4 = vld [vmem:[%s3634_s1 + $0x410] sm:$0xff] }
  0x6f   : > { %1871 = vmatpush.bf16.msrb.mxu3 %v2947_v61  ;;  %1795 = vmatmul.bf16.vlgmr.msra.gmra.mxu1 %v2095_v7  ;;  %v2968_v61 = vld [vmem:[%s3634_s1 + $0x4a0] sm:$0xff]  ;;  %v2974_v6 = vld [vmem:[%s3634_s1 + $0x4d0] sm:$0xff] }
  0x70   : > { %1843 = vmatpush.bf16.msrb.mxu1 %v2931_v5  ;;  %v2966_v5 = vld [vmem:[%s3634_s1 + $0x490] sm:$0xff] }
  0x71   : > { %1830 = vmatpush.bf16.msrb.mxu0 %v2922_v8  ;;  %v2958_v7 = vld [vmem:[%s3634_s1 + $0x450] sm:$0xff]  ;;  %v2949_v8 = vld [vmem:[%s3634_s1 + $0x408] sm:$0xff] }
  0x72   : > { %1858 = vmatpush.bf16.msrb.mxu2 %v2938_v9  ;;  %v2965_v9 = vld [vmem:[%s3634_s1 + $0x488] sm:$0xff] }
  0x73   : > { %1872 = vmatpush.bf16.msrb.mxu3 %v2946_v10  ;;  %v2973_v10 = vld [vmem:[%s3634_s1 + $0x4c8] sm:$0xff] }
  0x74   : > { %1844 = vmatpush.bf16.msrb.mxu1 %v2930_v11  ;;  %v2957_v11 = vld [vmem:[%s3634_s1 + $0x448] sm:$0xff] }
  0x75   : > { %1831 = vmatpush.bf16.msrb.mxu0 %v2921_v12  ;;  %v2948_v12 = vld [vmem:[%s3634_s1 + $0x400] sm:$0xff] }
  0x76   : > { %1859 = vmatpush.bf16.msrb.mxu2 %v2937_v13  ;;  %v2964_v13 = vld [vmem:[%s3634_s1 + $0x480] sm:$0xff] }
  0x77   : > { %1873 = vmatpush.bf16.msrb.mxu3 %v2945_v14  ;;  %v2972_v14 = vld [vmem:[%s3634_s1 + $0x4c0] sm:$0xff] }
  0x78   : > { %1845 = vmatpush.bf16.msrb.mxu1 %v2929_v15  ;;  %v2122_v15 = vld [vmem:[%s3165_s29 + $0x40] sm:$0xf] }
  0x79   : > { %1832 = vmatpush.bf16.msrb.mxu0 %v2920_v16  ;;  %v2817_v16 = vld [vmem:[%s3165_s29 + $0x90] sm:$0xf0] }
  0x7a   : > { %1860 = vmatpush.bf16.msrb.mxu2 %v2936_v17  ;;  %v2130_v17 = vld [vmem:[%s3165_s29 + $0x48] sm:$0xf] }
  0x7b   : > { %1874 = vmatpush.bf16.msrb.mxu3 %v2944_v18  ;;  %v2818_v18 = vld [vmem:[%s3165_s29 + $0x98] sm:$0xf0] }
  0x7c   : > { %1846 = vmatpush.bf16.msrb.mxu1 %v2928_v19  ;;  %v2808_v19 = vld [vmem:[%s3165_s29 + $0x4c] sm:$0xf] }
  0x7d   : > { %1833 = vmatpush.bf16.msrb.mxu0 %v2919_v20  ;;  %v2132_v20 = vld [vmem:[%s3165_s29 + $0x9c] sm:$0xf0] }
  0x7e   : > { %1861 = vmatpush.bf16.msrb.mxu2 %v2935_v21  ;;  %v2983_v21 = vld [vmem:[%s3634_s1 + $0x518] sm:$0xff] }
  0x7f   : > { %1875 = vmatpush.bf16.msrb.mxu3 %v2943_v22  ;;  %v2956_v22 = vld [vmem:[%s3634_s1 + $0x440] sm:$0xff] }
  0x80   : > { %1847 = vmatpush.bf16.msrb.mxu1 %v2927_v23  ;;  %v2123_v23 = vor.u32 %v2817_v16, %v2122_v15 }
  0x81   : > { %1834 = vmatpush.bf16.msrb.mxu0 %v2918_v24  ;;  %v2807_v24 = vld [vmem:[%s3165_s29 + $0x44] sm:$0xf] }
  0x82   : > { %1862 = vmatpush.bf16.msrb.mxu2 %v2934_v25  ;;  %v2124_v25 = vld [vmem:[%s3165_s29 + $0x94] sm:$0xf0] }
  0x83   : > { %1876 = vmatpush.bf16.msrb.mxu3 %v2942_v26  ;;  %v2131_v26 = vor.u32 %v2818_v18, %v2130_v17 }
  0x84   : > { %1848 = vmatpush.bf16.msrb.mxu1 %v2926_v27  ;;  %v2135_v27 = vor.u32 %v2808_v19, %v2132_v20 }
  0x85   : > { %1835 = vmatpush.bf16.msrb.mxu0 %v2917_v28  ;;  %v2127_v28 = vor.u32 %v2807_v24, %v2124_v25 }
  0x86   : > { %1863 = vmatpush.bf16.msrb.mxu2 %v2933_v29  ;;  %v2982_v29 = vld [vmem:[%s3634_s1 + $0x510] sm:$0xff] }
  0x87   : > { %1877 = vmatpush.bf16.msrb.mxu3 %v2941_v30  ;;  %v2981_v30 = vld [vmem:[%s3634_s1 + $0x508] sm:$0xff] }
  0x88   : > { %1849 = vmatpush.bf16.msrb.mxu1 %v2925_v31  ;;  %v2980_v31 = vld [vmem:[%s3634_s1 + $0x500] sm:$0xff] }
  0x89   : > { %1836 = vmatpush.bf16.msrb.mxu0 %v2916_v32  ;;  %v2138_v32 = vld [vmem:[%s3165_s29 + $0x50] sm:$0xf] }
  0x8a   : > { %1864 = vmatpush.bf16.msrb.mxu2 %v2932_v33  ;;  %v2819_v33 = vld [vmem:[%s3165_s29 + $0xa0] sm:$0xf0]  ;;  %s2055_s29 = sshll.u32 %s3642_s17, 3 }
  0x8b   : > { %1878 = vmatpush.bf16.msrb.mxu3 %v2940_v34  ;;  %v2139_v34 = vor.u32 %v2819_v33, %v2138_v32  ;;  %s211_s20 = scalar_lea.vmem %s3636_s3, %s2055_s29 }
  0x8c   : > { %1850 = vmatpush.bf16.msrb.mxu1 %v2924_v44  ;;  %1837 = vmatmul.bf16.vlgmr.msrb.gmra.mxu0 %v2107_v47 }
  0x8d   : > { %1885 = vmatpush.bf16.msra.mxu0 %v2955_v35  ;;  %1865 = vmatmul.bf16.vlgmr.msrb.gmra.mxu2 %v2115_v48 }
  0x8e   : > { %1913 = vmatpush.bf16.msra.mxu2 %v2971_v36  ;;  %1879 = vmatmul.bf16.vlgmr.msrb.gmra.mxu3 %v2119_v50 }
  0x8f   : > { %1927 = vmatpush.bf16.msra.mxu3 %v2979_v41  ;;  %1851 = vmatmul.bf16.vlgmr.msrb.gmra.mxu1 %v2111_v51 }
  0x90   : > { %1899 = vmatpush.bf16.msra.mxu1 %v2963_v49 }
  0x91   : > { %1886 = vmatpush.bf16.msra.mxu0 %v2954_v52 }
  0x92   : > { %1914 = vmatpush.bf16.msra.mxu2 %v2970_v53 }
  0x93   : > { %1928 = vmatpush.bf16.msra.mxu3 %v2978_v54 }
  0x94   : > { %1900 = vmatpush.bf16.msra.mxu1 %v2962_v55 }
  0x95   : > { %1887 = vmatpush.bf16.msra.mxu0 %v2953_v56 }
  0x96   : > { %1915 = vmatpush.bf16.msra.mxu2 %v2969_v57 }
  0x97   : > { %1929 = vmatpush.bf16.msra.mxu3 %v2977_v58 }
  0x98   : > { %1901 = vmatpush.bf16.msra.mxu1 %v2961_v59 }
  0x99   : > { %1888 = vmatpush.bf16.msra.mxu0 %v2952_v60 }
  0x9a   : > { %1916 = vmatpush.bf16.msra.mxu2 %v2968_v61 }
  0x9b   : > { %1930 = vmatpush.bf16.msra.mxu3 %v2976_v62 }
  0x9c   : > { %1902 = vmatpush.bf16.msra.mxu1 %v2960_v63 }
  0x9d   : > { %1889 = vmatpush.bf16.msra.mxu0 %v2951_v0 }
  0x9e   : > { %1917 = vmatpush.bf16.msra.mxu2 %v2967_v1 }
  0x9f   : > { %1931 = vmatpush.bf16.msra.mxu3 %v2975_v2 }
  0xa0   : > { %1903 = vmatpush.bf16.msra.mxu1 %v2959_v3 }
  0xa1   : > { %1890 = vmatpush.bf16.msra.mxu0 %v2950_v4 }
  0xa2   : > { %1918 = vmatpush.bf16.msra.mxu2 %v2966_v5 }
  0xa3   : > { %1932 = vmatpush.bf16.msra.mxu3 %v2974_v6 }
  0xa4   : > { %1904 = vmatpush.bf16.msra.mxu1 %v2958_v7 }
  0xa5   : > { %1891 = vmatpush.bf16.msra.mxu0 %v2949_v8 }
  0xa6   : > { %1919 = vmatpush.bf16.msra.mxu2 %v2965_v9 }
  0xa7   : > { %1933 = vmatpush.bf16.msra.mxu3 %v2973_v10 }
  0xa8   : > { %1905 = vmatpush.bf16.msra.mxu1 %v2957_v11 }
  0xa9   : > { %1892 = vmatpush.bf16.msra.mxu0 %v2948_v12  ;;  %v1670_v35 = vpop.f32.mrf.mxu0 }
  0xaa   : > { %1920 = vmatpush.bf16.msra.mxu2 %v2964_v13  ;;  %v1671_v46 = vadd.f32 %v3009_v43, %v1670_v35 }
  0xab   : > { %1934 = vmatpush.bf16.msra.mxu3 %v2972_v14 }
  0xac   : > { %1906 = vmatpush.bf16.msra.mxu1 %v2956_v22  ;;  %1893 = vmatmul.bf16.vlgmr.msra.gmra.mxu0 %v2123_v23  ;;  %v1684_v36 = vpop.f32.mrf.mxu1 }
  0xad   : > { %1945 = vmatpush.bf16.msrb.mxu0 %v2983_v21  ;;  %1921 = vmatmul.bf16.vlgmr.msra.gmra.mxu2 %v2131_v26  ;;  %v1685_v48 = vadd.f32 %v1684_v36, %v1671_v46 }
  0xae   : > { %1935 = vmatmul.bf16.vlgmr.msra.gmra.mxu3 %v2135_v27 }
  0xaf   : > { %1907 = vmatmul.bf16.vlgmr.msra.gmra.mxu1 %v2127_v28 }
  0xb0   : > { %v1698_v37 = vpop.f32.mrf.mxu2 }
  0xb1   : > { %1946 = vmatpush.bf16.msrb.mxu0 %v2982_v29  ;;  %v1672_v38 = vpop.f32.mrf.mxu0  ;;  %v1712_v39 = vpop.f32.mrf.mxu3  ;;  %v1699_v51 = vadd.f32 %v1698_v37, %v1685_v48 }
  0xb2   : > { %v1673_v53 = vadd.f32 %v3009_v43, %v1672_v38 }
  0xb3   : > { %v1713_v54 = vadd.f32 %v1712_v39, %v1699_v51 }
  0xb4   : > { %v1686_v40 = vpop.f32.mrf.mxu1 }
  0xb5   : > { %1947 = vmatpush.bf16.msrb.mxu0 %v2981_v30  ;;  %v1687_v57 = vadd.f32 %v1686_v40, %v1673_v53 }
  0xb8   : > { %v1700_v41 = vpop.f32.mrf.mxu2 }
  0xb9   : > { %1948 = vmatpush.bf16.msrb.mxu0 %v2980_v31  ;;  %v1714_v44 = vpop.f32.mrf.mxu3  ;;  %v1701_v61 = vadd.f32 %v1700_v41, %v1687_v57 }
  0xbb   : > { %v1715_v1 = vadd.f32 %v1714_v44, %v1701_v61 }
  0xbc   : > { %2796 = vmatmul.msk.bf16.vlgmr.msrb.gmra.mxu0 %vm1657_vm0, %v2139_v34 }
  0xc9   : > { %v1726_v42 = vpop.f32.mrf.mxu0 }
  0xca   : > { %v1727_v58 = vadd.f32 %v1726_v42, %v1713_v54 }
  0xcc   : > { %v1740_v45 = vpop.f32.mrf.mxu1 }
  0xcd   : > { %v1741_v62 = vadd.f32 %v1740_v45, %v1727_v58 }
  0xd0   : > { %v1754_v47 = vpop.f32.mrf.mxu2 }
  0xd1   : > { %v1728_v49 = vpop.f32.mrf.mxu0  ;;  %v1768_v50 = vpop.f32.mrf.mxu3  ;;  %v1755_v2 = vadd.f32 %v1754_v47, %v1741_v62 }
  0xd2   : > { %v1729_v4 = vadd.f32 %v1728_v49, %v1715_v1 }
  0xd3   : > { %v1769_v6 = vadd.f32 %v1768_v50, %v1755_v2 }
  0xd4   : > { %v1742_v52 = vpop.f32.mrf.mxu1 }
  0xd5   : > { %v1743_v7 = vadd.f32 %v1742_v52, %v1729_v4 }
  0xd8   : > { %v1756_v55 = vpop.f32.mrf.mxu2 }
  0xd9   : > { %v1770_v59 = vpop.f32.mrf.mxu3  ;;  %v1757_v11 = vadd.f32 %v1756_v55, %v1743_v7 }
  0xdb   : > { %v1771_v15 = vadd.f32 %v1770_v59, %v1757_v11 }
  0xe9   : > { %v1782_v56 = vpop.f32.mrf.mxu0 }
  0xea   : > { %v1783_v8 = vadd.f32 %v1782_v56, %v1769_v6 }
  0xec   : > { %v1796_v60 = vpop.f32.mrf.mxu1 }
  0xed   : > { %v1797_v12 = vadd.f32 %v1796_v60, %v1783_v8 }
  0xf0   : > { %v1810_v63 = vpop.f32.mrf.mxu2 }
  0xf1   : > { %v1784_v0 = vpop.f32.mrf.mxu0  ;;  %v1824_v3 = vpop.f32.mrf.mxu3  ;;  %v1811_v16 = vadd.f32 %v1810_v63, %v1797_v12 }
  0xf2   : > { %v1785_v17 = vadd.f32 %v1784_v0, %v1771_v15 }
  0xf3   : > { %v1825_v19 = vadd.f32 %v1824_v3, %v1811_v16 }
  0xf4   : > { %v1798_v5 = vpop.f32.mrf.mxu1 }
  0xf5   : > { %v1799_v21 = vadd.f32 %v1798_v5, %v1785_v17 }
  0xf8   : > { %v1812_v9 = vpop.f32.mrf.mxu2 }
  0xf9   : > { %v1826_v13 = vpop.f32.mrf.mxu3  ;;  %v1813_v24 = vadd.f32 %v1812_v9, %v1799_v21 }
  0xfb   : > { %v1827_v27 = vadd.f32 %v1826_v13, %v1813_v24 }
 0x109   : > { %v1838_v10 = vpop.f32.mrf.mxu0 }
 0x10a   : > { %v1839_v22 = vadd.f32 %v1838_v10, %v1825_v19 }
 0x10c   : > { %v1852_v14 = vpop.f32.mrf.mxu1 }
 0x10d   : > { %v1853_v26 = vadd.f32 %v1852_v14, %v1839_v22 }
 0x110   : > { %v1866_v18 = vpop.f32.mrf.mxu2 }
 0x111   : > { %v1840_v20 = vpop.f32.mrf.mxu0  ;;  %v1880_v23 = vpop.f32.mrf.mxu3  ;;  %v1867_v28 = vadd.f32 %v1866_v18, %v1853_v26 }
 0x112   : > { %v1841_v31 = vadd.f32 %v1840_v20, %v1827_v27 }
 0x113   : > { %v1881_v32 = vadd.f32 %v1880_v23, %v1867_v28 }
 0x114   : > { %v1854_v25 = vpop.f32.mrf.mxu1 }
 0x115   : > { %v1855_v35 = vadd.f32 %v1854_v25, %v1841_v31 }
 0x118   : > { %v1868_v29 = vpop.f32.mrf.mxu2 }
 0x119   : > { %v1882_v33 = vpop.f32.mrf.mxu3  ;;  %v1869_v37 = vadd.f32 %v1868_v29, %v1855_v35 }
 0x11b   : > { %v1883_v41 = vadd.f32 %v1882_v33, %v1869_v37 }
 0x129   : > { %v1894_v30 = vpop.f32.mrf.mxu0 }
 0x12a   : > { %v1895_v36 = vadd.f32 %v1894_v30, %v1881_v32 }
 0x12c   : > { %v1908_v34 = vpop.f32.mrf.mxu1 }
 0x12d   : > { %v1909_v40 = vadd.f32 %v1908_v34, %v1895_v36 }
 0x130   : > { %v1922_v38 = vpop.f32.mrf.mxu2 }
 0x131   : > { %v1896_v39 = vpop.f32.mrf.mxu0  ;;  %v1923_v42 = vadd.f32 %v1922_v38, %v1909_v40  ;;  %v1936_v43 = vpop.f32.mrf.mxu3 }
 0x132   : > { %v1897_v44 = vadd.f32 %v1896_v39, %v1883_v41 }
 0x133   : > { %v1937_v46 = vadd.f32 %v1936_v43, %v1923_v42 }
 0x134   : > { %v1910_v45 = vpop.f32.mrf.mxu1 }
 0x135   : > { %v1911_v49 = vadd.f32 %v1910_v45, %v1897_v44 }
 0x138   : > { %v1924_v47 = vpop.f32.mrf.mxu2 }
 0x139   : > { %v1950_v48 = vpop.f32.mrf.mxu0  ;;  %v1925_v51 = vadd.f32 %v1924_v47, %v1911_v49  ;;  %v1938_v52 = vpop.f32.mrf.mxu3 }
 0x13a   : > { %v1951_v50 = vadd.f32 %v1950_v48, %v1937_v46 }
 0x13b   : > { %v1939_v53 = vadd.f32 %v1938_v52, %v1925_v51 }
 0x13c   : > { %1955 = vst [vmem:[%s211_s20] sm:$0xff] %v1951_v50 }
 0x141   : > { %v1952_v54 = vpop.f32.mrf.mxu0 }
 0x142   : > { %v1953_v55 = vadd.f32 %v1952_v54, %v1939_v53 }
 0x144   : > { %1956 = vst [vmem:[%s211_s20 + $0x8] sm:$0xff] %v1953_v55 }
 0x145 PF: > { %s13_s14 = sadd.s32 1, %s3032_s14   ;;  %s3637_s12 = smov %s3028_s13 }
 0x146   : > { %p10_p5 = scmp.ge.s32.totalorder %s13_s14, 4   ;;  %s3638_s13 = smov %s3640_s15 }
 0x148   :  { %12 = sbr.rel (!%p10_p5) target bundleno = 2 (0x2), region = 62 }

</bundles_post_ra>
